<compile_context>
chip_gen: v7x
topology: tpu7x:2x2x1
jax: 0.10.0
libtpu: 0.0.40
codegen_flags: <defaults>
</compile_context>

<pallas_src>
import functools

import jax
import jax.numpy as jnp
from jax.experimental import pallas as pl
from jax.experimental.pallas import tpu as pltpu


LANE = 128                           # lane width / MXU-friendly padding unit
FUSED_MAX_NPAD = 2048                # int8 A + bf16 copy + X + h1 fit VMEM easily
VMEM_LIMIT_BYTES = 48 * 1024 * 1024  # safe on v5e/v6e (128 MiB) and v7x (64 MiB/TC)


def _round_up(x, m):
    return (x + m - 1) // m * m


def _pad2d(x, rows, cols):
    r, c = x.shape
    return jnp.pad(x, ((0, rows - r), (0, cols - c)))


def _pick_tile(n, candidates=(512, 256, 128)):
    """Largest candidate tile that divides n (n is always a multiple of 128)."""
    for c in candidates:
        if n % c == 0:
            return c
    return n


# ---------------------------------------------------------------------------
# Fused path: both GCN layers in one pallas_call, everything VMEM-resident.
# ---------------------------------------------------------------------------
def _gcn_fused_kernel(a_ref, x_ref, w1_ref, b1_ref, w2_ref, b2_ref, o_ref):
    """relu(A @ (X @ W1) + b1) -> relu(A @ (h1 @ W2) + b2), A read once."""
    a = a_ref[...].astype(jnp.bfloat16)            # int8 0/1 -> bf16 (exact)

    # Layer 1: pre-multiply X @ W1 (tiny), then one MXU pass over A.
    y1 = jnp.dot(x_ref[...], w1_ref[...],
                 preferred_element_type=jnp.float32).astype(jnp.bfloat16)
    h1 = jnp.maximum(
        jnp.dot(a, y1, preferred_element_type=jnp.float32) + b1_ref[...], 0.0)

    # Layer 2 reuses the already-resident A.
    y2 = jnp.dot(h1.astype(jnp.bfloat16), w2_ref[...],
                 preferred_element_type=jnp.float32).astype(jnp.bfloat16)
    o_ref[...] = jnp.maximum(
        jnp.dot(a, y2, preferred_element_type=jnp.float32) + b2_ref[...],
        0.0).astype(o_ref.dtype)


def _gcn_fused(a_i8, x_bf, w1_bf, b1_f, w2_bf, b2_f, out_dtype):
    n_pad = a_i8.shape[0]
    cd_pad = x_bf.shape[1]
    hd_pad = w1_bf.shape[1]
    od_pad = w2_bf.shape[1]

    def full_spec(shape):
        return pl.BlockSpec(shape, lambda i: (0,) * len(shape))

    return pl.pallas_call(
        _gcn_fused_kernel,
        out_shape=jax.ShapeDtypeStruct((n_pad, od_pad), out_dtype),
        grid=(1,),
        in_specs=[
            full_spec((n_pad, n_pad)),     # A (int8, resident)
            full_spec((n_pad, cd_pad)),    # X (bf16, resident)
            full_spec((cd_pad, hd_pad)),   # W1
            full_spec((1, hd_pad)),        # b1
            full_spec((hd_pad, od_pad)),   # W2
            full_spec((1, od_pad)),        # b2
        ],
        out_specs=full_spec((n_pad, od_pad)),
        compiler_params=pltpu.CompilerParams(
            vmem_limit_bytes=VMEM_LIMIT_BYTES),
    )(a_i8, x_bf, w1_bf, b1_f, w2_bf, b2_f)


# ---------------------------------------------------------------------------
# Streamed path for large graphs (n_pad > FUSED_MAX_NPAD).
# ---------------------------------------------------------------------------
def _dense_kernel(x_ref, w_ref, o_ref):
    """Row-tiled Y = X @ W (the small pre-multiplied RHS of the A stream)."""
    o_ref[...] = jnp.dot(x_ref[...], w_ref[...],
                         preferred_element_type=jnp.float32).astype(o_ref.dtype)


def _dense(x, w, out_dtype):
    n, din = x.shape
    dout = w.shape[1]
    tm = _pick_tile(n)
    assert n % tm == 0
    return pl.pallas_call(
        _dense_kernel,
        out_shape=jax.ShapeDtypeStruct((n, dout), out_dtype),
        grid=(n // tm,),
        in_specs=[
            pl.BlockSpec((tm, din), lambda i: (i, 0)),
            pl.BlockSpec((din, dout), lambda i: (0, 0)),
        ],
        out_specs=pl.BlockSpec((tm, dout), lambda i: (i, 0)),
        compiler_params=pltpu.CompilerParams(
            dimension_semantics=("parallel",),
            vmem_limit_bytes=VMEM_LIMIT_BYTES),
    )(x, w)


def _gcn_agg_kernel(a_ref, y_ref, b_ref, o_ref, acc_ref, *, tk):
    """One row tile of relu(A @ Y + b) with Y = X@W fully VMEM-resident.

    Grid = (row_tiles, k_tiles); k (contraction over source nodes) is last and
    'arbitrary'.  acc_ref holds the f32 aggregation; finalize is bias + relu.
    """
    k = pl.program_id(1)

    @pl.when(k == 0)
    def _init():
        acc_ref[...] = jnp.zeros_like(acc_ref)

    a = a_ref[...].astype(jnp.bfloat16)             # int8 -> bf16 after the DMA
    start = pl.multiple_of(k * tk, tk)
    acc_ref[...] += jnp.dot(a, y_ref[pl.ds(start, tk), :],
                            preferred_element_type=jnp.float32)

    @pl.when(k == pl.num_programs(1) - 1)
    def _finalize():
        o_ref[...] = jnp.maximum(acc_ref[...] + b_ref[...], 0.0).astype(o_ref.dtype)


def _gcn_agg(a_i8, y_bf, b_f, out_dtype):
    n_pad = a_i8.shape[0]
    dout = y_bf.shape[1]
    tm = _pick_tile(n_pad, (512, 256, 128))
    tk = _pick_tile(n_pad, (1024, 512, 256, 128))
    assert n_pad % tm == 0 and n_pad % tk == 0, (n_pad, tm, tk)
    grid = (n_pad // tm, n_pad // tk)

    return pl.pallas_call(
        functools.partial(_gcn_agg_kernel, tk=tk),
        out_shape=jax.ShapeDtypeStruct((n_pad, dout), out_dtype),
        grid=grid,
        in_specs=[
            pl.BlockSpec((tm, tk), lambda i, k: (i, k)),        # int8 A tile
            pl.BlockSpec((n_pad, dout), lambda i, k: (0, 0)),   # Y resident (fetched once)
            pl.BlockSpec((1, dout), lambda i, k: (0, 0)),       # bias resident
        ],
        out_specs=pl.BlockSpec((tm, dout), lambda i, k: (i, 0)),
        scratch_shapes=[pltpu.VMEM((tm, dout), jnp.float32)],
        compiler_params=pltpu.CompilerParams(
            # TODO(synk): on v7x use pltpu.CORE_PARALLEL on axis 0 (or
            # pl.core_map) to shard row tiles across the 2 TensorCores.
            dimension_semantics=("parallel", "arbitrary"),
            vmem_limit_bytes=VMEM_LIMIT_BYTES),
    )(a_i8, y_bf, b_f)


# ---------------------------------------------------------------------------
# Encoder wrapper.
# ---------------------------------------------------------------------------
def gcn_encoder(adj, cncpt_ids, emb_weight, w1, b1, w2, b2, force_streamed=False):
    """adj: (N, N) f32 with adj[i, j] = 1 iff edge j -> i; cncpt_ids: (N,) int32;
    emb_weight: (V, concept_dim); w1/w2 pre-transposed to (in, out)."""
    n = adj.shape[0]
    concept_dim = emb_weight.shape[1]
    hidden_dim = w1.shape[1]
    output_dim = w2.shape[1]

    # Embedding lookup (plain-JAX glue; negligible vs. the A matmuls).
    # TODO(synk): for huge vocab/N, fuse the row gather into the kernel via
    # PrefetchScalarGridSpec(num_scalar_prefetch=1) + pl.Element row gather.
    features = jnp.take(emb_weight, cncpt_ids, axis=0)        # (N, concept_dim)

    # Pad to MXU / vreg friendly shapes: feature lanes -> exactly 128 (do not
    # over-pad; real dims are 32/64), rows -> multiple of 128.
    n_pad = _round_up(max(n, LANE), LANE)
    cd_pad = _round_up(concept_dim, LANE)
    hd_pad = _round_up(hidden_dim, LANE)
    od_pad = _round_up(output_dim, LANE)

    # Adjacency values are exactly 0/1 -> int8 in HBM (halves the dominant
    # stream); cast to bf16 inside the kernels.  Activations/weights in bf16,
    # accumulation stays f32 inside the kernels.
    a_i8 = _pad2d(adj, n_pad, n_pad).astype(jnp.int8)
    x_bf = _pad2d(features, n_pad, cd_pad).astype(jnp.bfloat16)

    # Zero-padded weights / biases keep padded lanes exactly zero after relu.
    w1_bf = _pad2d(w1, cd_pad, hd_pad).astype(jnp.bfloat16)
    w2_bf = _pad2d(w2, hd_pad, od_pad).astype(jnp.bfloat16)
    b1_f = _pad2d(b1.reshape(1, -1), 1, hd_pad).astype(jnp.float32)
    b2_f = _pad2d(b2.reshape(1, -1), 1, od_pad).astype(jnp.float32)

    if n_pad <= FUSED_MAX_NPAD and not force_streamed:
        # Single launch, A read from HBM once, no h1 round trip.
        h2 = _gcn_fused(a_i8, x_bf, w1_bf, b1_f, w2_bf, b2_f, jnp.float32)
    else:
        # Large graphs: stream A; Y = X@W pre-multiplied and VMEM-resident.
        y1 = _dense(x_bf, w1_bf, jnp.bfloat16)                 # X @ W1
        h1 = _gcn_agg(a_i8, y1, b1_f, jnp.bfloat16)            # relu(A @ y1 + b1)
        y2 = _dense(h1, w2_bf, jnp.bfloat16)                   # h1 @ W2
        h2 = _gcn_agg(a_i8, y2, b2_f, jnp.float32)             # relu(A @ y2 + b2)

    # Strip row / lane padding.
    return h2[:n, :output_dim]


def reference(adj, cncpt_ids, emb_weight, w1, b1, w2, b2):
    feat = emb_weight[cncpt_ids]
    h1 = jax.nn.relu(adj @ feat @ w1 + b1)
    h2 = jax.nn.relu(adj @ h1 @ w2 + b2)
    return h2


if __name__ == "__main__":
    key = jax.random.PRNGKey(0)

    # Small shapes consistent with the module.
    num_nodes = 16          # N nodes in the graph
    vocab = 50              # size of pretrained_concept_emd
    concept_dim = 32
    hidden_dim = 64
    output_dim = 32

    k_emb, k_w1, k_b1, k_w2, k_b2, k_adj, k_ids = jax.random.split(key, 7)

    emb_weight = jax.random.normal(k_emb, (vocab, concept_dim), jnp.float32) * 0.1
    # nn.Linear(in, out) -> weight (out, in); stored transposed as (in, out).
    w1 = jax.random.normal(k_w1, (concept_dim, hidden_dim), jnp.float32) * 0.1
    b1 = jax.random.normal(k_b1, (hidden_dim,), jnp.float32) * 0.1
    w2 = jax.random.normal(k_w2, (hidden_dim, output_dim), jnp.float32) * 0.1
    b2 = jax.random.normal(k_b2, (output_dim,), jnp.float32) * 0.1

    # Synthetic graph: random directed adjacency (A[i, j]=1 iff edge j -> i),
    # plus self-loops.
    adj = (jax.random.uniform(k_adj, (num_nodes, num_nodes)) < 0.3).astype(jnp.float32)
    adj = jnp.maximum(adj, jnp.eye(num_nodes, dtype=jnp.float32))

    cncpt_ids = jax.random.randint(k_ids, (num_nodes,), 0, vocab, dtype=jnp.int32)

    gcn_jit = jax.jit(gcn_encoder, static_argnames=("force_streamed",))
    ref = reference(adj, cncpt_ids, emb_weight, w1, b1, w2, b2)

    # 1) Default (fused, fully VMEM-resident) path.
    out = jax.block_until_ready(gcn_jit(adj, cncpt_ids, emb_weight, w1, b1, w2, b2))
    assert out.shape == (num_nodes, output_dim)
    # bf16 operands on the MXU (f32 accumulation) -> small error vs. f32 ref.
    assert jnp.allclose(out, ref, atol=3e-2, rtol=3e-2), (
        float(jnp.max(jnp.abs(out - ref))))

    # 2) Streamed large-graph path (forced, to exercise/validate it as well).
    out_s = jax.block_until_ready(
        gcn_jit(adj, cncpt_ids, emb_weight, w1, b1, w2, b2, force_streamed=True))
    assert out_s.shape == (num_nodes, output_dim)
    assert jnp.allclose(out_s, ref, atol=3e-2, rtol=3e-2), (
        float(jnp.max(jnp.abs(out_s - ref))))

    print("KERNEL_OK")
</pallas_src>

<mosaic_0001>
module attributes {stable_mosaic.version = 11 : i64} {
  func.func @_gcn_fused_kernel(%arg0: i32, %arg1: memref<128x128xi8, #tpu.memory_space<vmem>>, %arg2: memref<128x128xbf16, #tpu.memory_space<vmem>>, %arg3: memref<128x128xbf16, #tpu.memory_space<vmem>>, %arg4: memref<1x128xf32, #tpu.memory_space<vmem>>, %arg5: memref<128x128xbf16, #tpu.memory_space<vmem>>, %arg6: memref<1x128xf32, #tpu.memory_space<vmem>>, %arg7: memref<128x128xf32, #tpu.memory_space<vmem>>) attributes {dimension_semantics = [#tpu.dimension_semantics<arbitrary>], iteration_bounds = array<i64: 1>, scalar_prefetch = 0 : i64, scratch_operands = 0 : i64, tpu.core_type = #tpu.core_type<tc>, window_params = [{pipeline_mode = #tpu.pipeline_mode<synchronous>, transform_indices = @transform_0, window_bounds = array<i64: 128, 128>}, {pipeline_mode = #tpu.pipeline_mode<synchronous>, transform_indices = @transform_1, window_bounds = array<i64: 128, 128>}, {pipeline_mode = #tpu.pipeline_mode<synchronous>, transform_indices = @transform_2, window_bounds = array<i64: 128, 128>}, {pipeline_mode = #tpu.pipeline_mode<synchronous>, transform_indices = @transform_3, window_bounds = array<i64: 1, 128>}, {pipeline_mode = #tpu.pipeline_mode<synchronous>, transform_indices = @transform_4, window_bounds = array<i64: 128, 128>}, {pipeline_mode = #tpu.pipeline_mode<synchronous>, transform_indices = @transform_5, window_bounds = array<i64: 1, 128>}, {pipeline_mode = #tpu.pipeline_mode<synchronous>, transform_indices = @transform_6, window_bounds = array<i64: 128, 128>}]} {
    %c0 = arith.constant 0 : index
    %c0_0 = arith.constant 0 : index
    %0 = vector.load %arg1[%c0, %c0_0] : memref<128x128xi8, #tpu.memory_space<vmem>>, vector<128x128xi8>
    %1 = arith.sitofp %0 : vector<128x128xi8> to vector<128x128xbf16>
    %c0_1 = arith.constant 0 : index
    %c0_2 = arith.constant 0 : index
    %2 = vector.load %arg2[%c0_1, %c0_2] : memref<128x128xbf16, #tpu.memory_space<vmem>>, vector<128x128xbf16>
    %c0_3 = arith.constant 0 : index
    %c0_4 = arith.constant 0 : index
    %3 = vector.load %arg3[%c0_3, %c0_4] : memref<128x128xbf16, #tpu.memory_space<vmem>>, vector<128x128xbf16>
    %cst = arith.constant dense<0.000000e+00> : vector<128x128xf32>
    %4 = tpu.matmul %2, %3, %cst {dimension_numbers = #tpu.dot_dimension_numbers<[1], [0], [0], [1], [0, 0, 1, 1], [], []>} : vector<128x128xbf16>, vector<128x128xbf16>, vector<128x128xf32> -> vector<128x128xf32>
    %5 = arith.truncf %4 : vector<128x128xf32> to vector<128x128xbf16>
    %cst_5 = arith.constant dense<0.000000e+00> : vector<128x128xf32>
    %6 = tpu.matmul %1, %5, %cst_5 {dimension_numbers = #tpu.dot_dimension_numbers<[1], [0], [0], [1], [0, 0, 1, 1], [], []>} : vector<128x128xbf16>, vector<128x128xbf16>, vector<128x128xf32> -> vector<128x128xf32>
    %c0_6 = arith.constant 0 : index
    %c0_7 = arith.constant 0 : index
    %7 = vector.load %arg4[%c0_6, %c0_7] : memref<1x128xf32, #tpu.memory_space<vmem>>, vector<1x128xf32>
    %8 = vector.broadcast %7 : vector<1x128xf32> to vector<128x128xf32>
    %9 = arith.addf %6, %8 : vector<128x128xf32>
    %cst_8 = arith.constant 0.000000e+00 : f32
    %10 = vector.broadcast %cst_8 : f32 to vector<128x128xf32>
    %11 = arith.maximumf %9, %10 : vector<128x128xf32>
    %12 = arith.truncf %11 : vector<128x128xf32> to vector<128x128xbf16>
    %c0_9 = arith.constant 0 : index
    %c0_10 = arith.constant 0 : index
    %13 = vector.load %arg5[%c0_9, %c0_10] : memref<128x128xbf16, #tpu.memory_space<vmem>>, vector<128x128xbf16>
    %cst_11 = arith.constant dense<0.000000e+00> : vector<128x128xf32>
    %14 = tpu.matmul %12, %13, %cst_11 {dimension_numbers = #tpu.dot_dimension_numbers<[1], [0], [0], [1], [0, 0, 1, 1], [], []>} : vector<128x128xbf16>, vector<128x128xbf16>, vector<128x128xf32> -> vector<128x128xf32>
    %15 = arith.truncf %14 : vector<128x128xf32> to vector<128x128xbf16>
    %cst_12 = arith.constant dense<0.000000e+00> : vector<128x128xf32>
    %16 = tpu.matmul %1, %15, %cst_12 {dimension_numbers = #tpu.dot_dimension_numbers<[1], [0], [0], [1], [0, 0, 1, 1], [], []>} : vector<128x128xbf16>, vector<128x128xbf16>, vector<128x128xf32> -> vector<128x128xf32>
    %c0_13 = arith.constant 0 : index
    %c0_14 = arith.constant 0 : index
    %17 = vector.load %arg6[%c0_13, %c0_14] : memref<1x128xf32, #tpu.memory_space<vmem>>, vector<1x128xf32>
    %18 = vector.broadcast %17 : vector<1x128xf32> to vector<128x128xf32>
    %19 = arith.addf %16, %18 : vector<128x128xf32>
    %cst_15 = arith.constant 0.000000e+00 : f32
    %20 = vector.broadcast %cst_15 : f32 to vector<128x128xf32>
    %21 = arith.maximumf %19, %20 : vector<128x128xf32>
    %c0_16 = arith.constant 0 : index
    %c0_17 = arith.constant 0 : index
    %22 = vector.load %arg7[%c0_16, %c0_17] : memref<128x128xf32, #tpu.memory_space<vmem>>, vector<128x128xf32>
    tpu.vector_store %arg7[%c0_16, %c0_17], %21 {strides = array<i32>} : memref<128x128xf32, #tpu.memory_space<vmem>>, vector<128x128xf32>,
    return
  }
  func.func @transform_0(%arg0: i32) -> (i32, i32) {
    %c0_i32 = arith.constant 0 : i32
    %c0_i32_0 = arith.constant 0 : i32
    %c0_i32_1 = arith.constant 0 : i32
    return %c0_i32, %c0_i32_0 : i32, i32
  }
  func.func @transform_1(%arg0: i32) -> (i32, i32) {
    %c0_i32 = arith.constant 0 : i32
    %c0_i32_0 = arith.constant 0 : i32
    %c0_i32_1 = arith.constant 0 : i32
    return %c0_i32, %c0_i32_0 : i32, i32
  }
  func.func @transform_2(%arg0: i32) -> (i32, i32) {
    %c0_i32 = arith.constant 0 : i32
    %c0_i32_0 = arith.constant 0 : i32
    %c0_i32_1 = arith.constant 0 : i32
    return %c0_i32, %c0_i32_0 : i32, i32
  }
  func.func @transform_3(%arg0: i32) -> (i32, i32) {
    %c0_i32 = arith.constant 0 : i32
    %c0_i32_0 = arith.constant 0 : i32
    %c0_i32_1 = arith.constant 0 : i32
    return %c0_i32, %c0_i32_0 : i32, i32
  }
  func.func @transform_4(%arg0: i32) -> (i32, i32) {
    %c0_i32 = arith.constant 0 : i32
    %c0_i32_0 = arith.constant 0 : i32
    %c0_i32_1 = arith.constant 0 : i32
    return %c0_i32, %c0_i32_0 : i32, i32
  }
  func.func @transform_5(%arg0: i32) -> (i32, i32) {
    %c0_i32 = arith.constant 0 : i32
    %c0_i32_0 = arith.constant 0 : i32
    %c0_i32_1 = arith.constant 0 : i32
    return %c0_i32, %c0_i32_0 : i32, i32
  }
  func.func @transform_6(%arg0: i32) -> (i32, i32) {
    %c0_i32 = arith.constant 0 : i32
    %c0_i32_0 = arith.constant 0 : i32
    %c0_i32_1 = arith.constant 0 : i32
    return %c0_i32, %c0_i32_0 : i32, i32
  }
}

</mosaic_0001>

<bundles_post_ra>
// kernel: gcn_encoder.1
= control target key start
LH: loop header
LB: loop body
LE: loop exit
PB: predicated region body
PF: predicated region fallthrough
CT: control target
= control target key end

     0   :  { %s1169_s2 = inlined_call_operand.vmem [shape: bf16[128,128], index: 2, kind: input, shape index: {}]   ;;  %s1170_s1 = inlined_call_operand.vmem [shape: bf16[128,128], index: 1, kind: input, shape index: {}]   ;;  %s1171_s0 = inlined_call_operand.vmem [shape: s8[128,128], index: 0, kind: input, shape index: {}]   ;;  %s1172_s4 = inlined_call_operand.vmem [shape: bf16[128,128], index: 4, kind: input, shape index: {}]   ;;  %s1173_s3 = inlined_call_operand.vmem [shape: f32[1,128], index: 3, kind: input, shape index: {}]   ;;  %s1174_s5 = inlined_call_operand.vmem [shape: f32[1,128], index: 5, kind: input, shape index: {}]   ;;  %s1175_s6 = inlined_call_operand.vmem [shape: f32[128,128], index: 6, kind: output, shape index: {}]  }
   0x1   :  { %v924_v0 = vld [vmem:[%s1169_s2] sm:$0xff]   ;;  %v925_v1 = vld [vmem:[%s1169_s2 + $0x8] sm:$0xff]   ;;  %v926_v2 = vld [vmem:[%s1169_s2 + $0x10] sm:$0xff]  }
   0x2   :  { %796 = vmatprep.subr.bf16.mxu0 %v924_v0  ;;  %v927_v3 = vld [vmem:[%s1169_s2 + $0x18] sm:$0xff]   ;;  %v932_v4 = vld [vmem:[%s1170_s1] sm:$0xff]   ;;  %v929_v6 = vld [vmem:[%s1169_s2 + $0x28] sm:$0xff]  }
   0x3   :  { %797 = vmatpush3.bf16.msra.mxu0 %v924_v0  ;;  %812 = vmatprep.mubr.bf16.mxu0 %v932_v4  ;;  %v928_v5 = vld [vmem:[%s1169_s2 + $0x20] sm:$0xff]   ;;  %v930_v7 = vld [vmem:[%s1169_s2 + $0x30] sm:$0xff]   ;;  %v931_v8 = vld [vmem:[%s1169_s2 + $0x38] sm:$0xff]  }
   0x4   :  { %798 = vmatprep.subr.bf16.mxu0 %v925_v1  ;;  %v933_v9 = vld [vmem:[%s1170_s1 + $0x8] sm:$0xff]   ;;  %v934_v10 = vld [vmem:[%s1170_s1 + $0x10] sm:$0xff]   ;;  %v935_v11 = vld [vmem:[%s1170_s1 + $0x18] sm:$0xff]  }
   0x5   :  { %v936_v12 = vld [vmem:[%s1170_s1 + $0x20] sm:$0xff]   ;;  %v937_v13 = vld [vmem:[%s1170_s1 + $0x28] sm:$0xff]   ;;  %v938_v14 = vld [vmem:[%s1170_s1 + $0x30] sm:$0xff]  }
   0x6   :  { %v939_v15 = vld [vmem:[%s1170_s1 + $0x38] sm:$0xff]   ;;  %v1034_v16 = vld [vmem:[%s1171_s0] sm:$0xff]  ;;  %v941_v19 = vld [vmem:[%s1172_s4 + $0x8] sm:$0xff]  }
   0x7   :  { %799 = vmatpush3.bf16.msra.mxu0 %v925_v1  ;;  %v28_v17 = vunpack.c.l.s8.bf16 %v1034_v16  ;;  %v940_v18 = vld [vmem:[%s1172_s4] sm:$0xff]   ;;  %v942_v20 = vld [vmem:[%s1172_s4 + $0x10] sm:$0xff]   ;;  %v943_v21 = vld [vmem:[%s1172_s4 + $0x18] sm:$0xff]   ;;  %v29_v49 = vunpack.c.h.s8.bf16 %v1034_v16 }
   0x8   :  { %800 = vmatprep.subr.bf16.mxu0 %v926_v2  ;;  %v944_v22 = vld [vmem:[%s1172_s4 + $0x20] sm:$0xff]   ;;  %v945_v23 = vld [vmem:[%s1172_s4 + $0x28] sm:$0xff]   ;;  %v1071_v51 = vld [vmem:[%s1171_s0 + $0x10] sm:$0xff] }
   0x9   :  { %844 = vmatprep.mubr.bf16.mxu1 %v28_v17  ;;  %v1060_v48 = vld [vmem:[%s1171_s0 + $0x8] sm:$0xff]  ;;  %v32_v53 = vunpack.c.l.s8.bf16 %v1071_v51  ;;  %v1082_v54 = vld [vmem:[%s1171_s0 + $0x18] sm:$0xff]  ;;  %v33_v55 = vunpack.c.h.s8.bf16 %v1071_v51  ;;  %v946_v58 = vld [vmem:[%s1172_s4 + $0x30] sm:$0xff]  }
   0xa   :  { %v30_v50 = vunpack.c.l.s8.bf16 %v1060_v48  ;;  %v31_v52 = vunpack.c.h.s8.bf16 %v1060_v48  ;;  %v34_v56 = vunpack.c.l.s8.bf16 %v1082_v54  ;;  %v35_v57 = vunpack.c.h.s8.bf16 %v1082_v54  ;;  %v947_v59 = vld [vmem:[%s1172_s4 + $0x38] sm:$0xff]   ;;  %v722_v60 = vld [vmem:[%s1173_s3] ss:$0 sm:$0xff] }
   0xb   :  { %801 = vmatpush3.bf16.msra.mxu0 %v926_v2  ;;  %v731_v16 = vld [vmem:[%s1174_s5] ss:$0 sm:$0xff] }
   0xc   :  { %802 = vmatprep.subr.bf16.mxu0 %v927_v3 }
   0xf   :  { %803 = vmatpush3.bf16.msra.mxu0 %v927_v3 }
  0x10   :  { %804 = vmatprep.subr.bf16.mxu0 %v928_v5 }
  0x13   :  { %805 = vmatpush3.bf16.msra.mxu0 %v928_v5 }
  0x14   :  { %806 = vmatprep.subr.bf16.mxu0 %v929_v6 }
  0x17   :  { %807 = vmatpush3.bf16.msra.mxu0 %v929_v6 }
  0x18   :  { %808 = vmatprep.subr.bf16.mxu0 %v930_v7 }
  0x1b   :  { %809 = vmatpush3.bf16.msra.mxu0 %v930_v7 }
  0x1c   :  { %810 = vmatprep.subr.bf16.mxu0 %v931_v8 }
  0x1f   :  { %811 = vmatpush3.bf16.msra.mxu0 %v931_v8 }
  0x20   :  { %860 = vmatprep.subr.bf16.mxu0 %v940_v18 }
  0x22   :  { %813 = vmatmul.mubr.bf16.vlgmr.msra.gmra.mrb[0].mxu0 %v933_v9 }
  0x23   :  { %816 = vmatprep.mubr.bf16.mxu0 %v934_v10  ;;  %861 = vmatpush3.bf16.msra.mxu0 %v940_v18 }
  0x24   :  { %862 = vmatprep.subr.bf16.mxu0 %v941_v19 }
  0x27   :  { %863 = vmatpush3.bf16.msra.mxu0 %v941_v19 }
  0x28   :  { %864 = vmatprep.subr.bf16.mxu0 %v942_v20 }
  0x2a   :  { %817 = vmatmul.mubr.bf16.gmra.mrb[4].mxu0 %v935_v11 }
  0x2b   :  { %820 = vmatprep.mubr.bf16.mxu0 %v936_v12  ;;  %865 = vmatpush3.bf16.msra.mxu0 %v942_v20 }
  0x2c   :  { %866 = vmatprep.subr.bf16.mxu0 %v943_v21 }
  0x2f   :  { %867 = vmatpush3.bf16.msra.mxu0 %v943_v21 }
  0x30   :  { %868 = vmatprep.subr.bf16.mxu0 %v944_v22 }
  0x32   :  { %821 = vmatmul.mubr.bf16.gmra.mrb[8].mxu0 %v937_v13 }
  0x33   :  { %824 = vmatprep.mubr.bf16.mxu0 %v938_v14  ;;  %869 = vmatpush3.bf16.msra.mxu0 %v944_v22 }
  0x34   :  { %870 = vmatprep.subr.bf16.mxu0 %v945_v23 }
  0x37   :  { %871 = vmatpush3.bf16.msra.mxu0 %v945_v23 }
  0x38   :  { %872 = vmatprep.subr.bf16.mxu0 %v946_v58 }
  0x3a   :  { %825 = vmatmul.mubr.bf16.gmra.mrb[12].mxu0 %v939_v15 }
  0x3b   :  { %873 = vmatpush3.bf16.msra.mxu0 %v946_v58 }
  0x3c   :  { %874 = vmatprep.subr.bf16.mxu0 %v947_v59 }
  0x3f   :  { %875 = vmatpush3.bf16.msra.mxu0 %v947_v59 }
  0xf5   :  { %v814_v24 = vpop.f32.mrb[0].mxu0 }
  0xf6   :  { %v198_v25 = vpop.f32.mrb[1].mxu0 }
  0xf7   :  { %v815_v26 = vpop.f32.mrb[2].mxu0 }
  0xf8   :  { %v262_v27 = vpack.c.bf16 %v815_v26, %v814_v24  ;;  %v201_v28 = vpop.f32.mrb[3].mxu0 }
  0xf9   :  { %v261_v29 = vpack.c.bf16 %v201_v28, %v198_v25 }
  0xfb   :  { %828 = vmatprep.subr.bf16.mxu1 %v261_v29 }
  0xfc   :  { %829 = vmatpush3.bf16.msra.mxu1 %v261_v29 }
  0xfd   :  { %v818_v30 = vpop.f32.mrb[4].mxu0  ;;  %830 = vmatprep.subr.bf16.mxu1 %v262_v27 }
  0xfe   :  { %v214_v31 = vpop.f32.mrb[5].mxu0 }
  0xff   :  { %v819_v32 = vpop.f32.mrb[6].mxu0 }
 0x100   :  { %v264_v33 = vpack.c.bf16 %v819_v32, %v818_v30  ;;  %v217_v34 = vpop.f32.mrb[7].mxu0  ;;  %831 = vmatpush3.bf16.msra.mxu1 %v262_v27 }
 0x101   :  { %v263_v35 = vpack.c.bf16 %v217_v34, %v214_v31 }
 0x103   :  { %832 = vmatprep.subr.bf16.mxu1 %v263_v35 }
 0x104   :  { %833 = vmatpush3.bf16.msra.mxu1 %v263_v35 }
 0x105   :  { %v822_v36 = vpop.f32.mrb[8].mxu0  ;;  %834 = vmatprep.subr.bf16.mxu1 %v264_v33 }
 0x106   :  { %v230_v37 = vpop.f32.mrb[9].mxu0 }
 0x107   :  { %v823_v38 = vpop.f32.mrb[10].mxu0 }
 0x108   :  { %v266_v39 = vpack.c.bf16 %v823_v38, %v822_v36  ;;  %v233_v40 = vpop.f32.mrb[11].mxu0  ;;  %835 = vmatpush3.bf16.msra.mxu1 %v264_v33 }
 0x109   :  { %v265_v41 = vpack.c.bf16 %v233_v40, %v230_v37 }
 0x10b   :  { %836 = vmatprep.subr.bf16.mxu1 %v265_v41 }
 0x10c   :  { %837 = vmatpush3.bf16.msra.mxu1 %v265_v41 }
 0x10d   :  { %v826_v42 = vpop.f32.mrb[12].mxu0  ;;  %838 = vmatprep.subr.bf16.mxu1 %v266_v39 }
 0x10e   :  { %v246_v43 = vpop.f32.mrb[13].mxu0 }
 0x10f   :  { %v827_v44 = vpop.f32.mrb[14].mxu0 }
 0x110   :  { %v268_v45 = vpack.c.bf16 %v827_v44, %v826_v42  ;;  %v249_v46 = vpop.f32.mrb[15].mxu0  ;;  %839 = vmatpush3.bf16.msra.mxu1 %v266_v39 }
 0x111   :  { %v267_v47 = vpack.c.bf16 %v249_v46, %v246_v43 }
 0x113   :  { %840 = vmatprep.subr.bf16.mxu1 %v267_v47 }
 0x114   :  { %841 = vmatpush3.bf16.msra.mxu1 %v267_v47 }
 0x115   :  { %842 = vmatprep.subr.bf16.mxu1 %v268_v45 }
 0x118   :  { %843 = vmatpush3.bf16.msra.mxu1 %v268_v45 }
 0x11b   :  { %845 = vmatmul.mubr.bf16.vlgmr.msra.gmra.mrb[0].mxu1 %v29_v49 }
 0x11c   :  { %848 = vmatprep.mubr.bf16.mxu1 %v30_v50 }
 0x123   :  { %849 = vmatmul.mubr.bf16.gmra.mrb[4].mxu1 %v31_v52 }
 0x124   :  { %852 = vmatprep.mubr.bf16.mxu1 %v32_v53 }
 0x12b   :  { %853 = vmatmul.mubr.bf16.gmra.mrb[8].mxu1 %v33_v55 }
 0x12c   :  { %856 = vmatprep.mubr.bf16.mxu1 %v34_v56 }
 0x133   :  { %857 = vmatmul.mubr.bf16.gmra.mrb[12].mxu1 %v35_v57 }
 0x134   :  { %908 = vmatprep.mubr.bf16.mxu1 %v28_v17 }
 0x1ee   :  { %v846_v61 = vpop.f32.mrb[0].mxu1 }
 0x1ef   :  { %v319_v62 = vadd.f32 %v846_v61, %v722_v60  ;;  %v310_v63 = vpop.f32.mrb[1].mxu1 }
 0x1f0   :  { %v311_v0 = vadd.f32 %v722_v60, %v310_v63  ;;  %v847_v1 = vpop.f32.mrb[2].mxu1 }
 0x1f1   :  { %v322_v2 = vadd.f32 %v847_v1, %v722_v60  ;;  %v313_v3 = vpop.f32.mrb[3].mxu1  ;;  %v375_v5 = vmax.f32 %v319_v62, 0.0 }
 0x1f2   :  { %v314_v4 = vadd.f32 %v722_v60, %v313_v3  ;;  %v373_v7 = vmax.f32 %v311_v0, 0.0 }
 0x1f3   :  { %v376_v6 = vmax.f32 %v322_v2, 0.0 }
 0x1f4   :  { %v374_v8 = vmax.f32 %v314_v4, 0.0 }
 0x1f5   :  { %v390_v9 = vpack.c.bf16 %v376_v6, %v375_v5 }
 0x1f6   :  { %v389_v10 = vpack.c.bf16 %v374_v8, %v373_v7  ;;  %v850_v11 = vpop.f32.mrb[4].mxu1 }
 0x1f7   :  { %v335_v12 = vadd.f32 %v850_v11, %v722_v60  ;;  %v326_v13 = vpop.f32.mrb[5].mxu1 }
 0x1f8   :  { %v327_v14 = vadd.f32 %v722_v60, %v326_v13  ;;  %v851_v15 = vpop.f32.mrb[6].mxu1  ;;  %876 = vmatprep.mubr.bf16.mxu0 %v389_v10 }
 0x1f9   :  { %v338_v17 = vadd.f32 %v851_v15, %v722_v60  ;;  %v329_v18 = vpop.f32.mrb[7].mxu1  ;;  %877 = vmatmul.mubr.bf16.vlgmr.msra.gmra.mrb[16].mxu0 %v390_v9  ;;  %v379_v20 = vmax.f32 %v335_v12, 0.0 }
 0x1fa   :  { %v330_v19 = vadd.f32 %v722_v60, %v329_v18  ;;  %v377_v22 = vmax.f32 %v327_v14, 0.0 }
 0x1fb   :  { %v380_v21 = vmax.f32 %v338_v17, 0.0 }
 0x1fc   :  { %v378_v23 = vmax.f32 %v330_v19, 0.0 }
 0x1fd   :  { %v392_v24 = vpack.c.bf16 %v380_v21, %v379_v20 }
 0x1fe   :  { %v391_v25 = vpack.c.bf16 %v378_v23, %v377_v22  ;;  %v854_v26 = vpop.f32.mrb[8].mxu1 }
 0x1ff   :  { %v351_v27 = vadd.f32 %v854_v26, %v722_v60  ;;  %v342_v28 = vpop.f32.mrb[9].mxu1 }
 0x200   :  { %v343_v29 = vadd.f32 %v722_v60, %v342_v28  ;;  %v855_v30 = vpop.f32.mrb[10].mxu1  ;;  %880 = vmatprep.mubr.bf16.mxu0 %v391_v25 }
 0x201   :  { %v354_v31 = vadd.f32 %v855_v30, %v722_v60  ;;  %v345_v32 = vpop.f32.mrb[11].mxu1  ;;  %881 = vmatmul.mubr.bf16.gmra.mrb[20].mxu0 %v392_v24  ;;  %v383_v34 = vmax.f32 %v351_v27, 0.0 }
 0x202   :  { %v346_v33 = vadd.f32 %v722_v60, %v345_v32  ;;  %v381_v36 = vmax.f32 %v343_v29, 0.0 }
 0x203   :  { %v384_v35 = vmax.f32 %v354_v31, 0.0 }
 0x204   :  { %v382_v37 = vmax.f32 %v346_v33, 0.0 }
 0x205   :  { %v394_v38 = vpack.c.bf16 %v384_v35, %v383_v34 }
 0x206   :  { %v393_v39 = vpack.c.bf16 %v382_v37, %v381_v36  ;;  %v858_v40 = vpop.f32.mrb[12].mxu1 }
 0x207   :  { %v367_v41 = vadd.f32 %v858_v40, %v722_v60  ;;  %v358_v42 = vpop.f32.mrb[13].mxu1 }
 0x208   :  { %v359_v43 = vadd.f32 %v722_v60, %v358_v42  ;;  %v859_v44 = vpop.f32.mrb[14].mxu1  ;;  %884 = vmatprep.mubr.bf16.mxu0 %v393_v39 }
 0x209   :  { %v370_v45 = vadd.f32 %v859_v44, %v722_v60  ;;  %v361_v46 = vpop.f32.mrb[15].mxu1  ;;  %885 = vmatmul.mubr.bf16.gmra.mrb[24].mxu0 %v394_v38  ;;  %v387_v58 = vmax.f32 %v367_v41, 0.0 }
 0x20a   :  { %v362_v47 = vadd.f32 %v722_v60, %v361_v46  ;;  %v385_v61 = vmax.f32 %v359_v43, 0.0 }
 0x20b   :  { %v388_v59 = vmax.f32 %v370_v45, 0.0 }
 0x20c   :  { %v386_v62 = vmax.f32 %v362_v47, 0.0 }
 0x20d   :  { %v396_v63 = vpack.c.bf16 %v388_v59, %v387_v58 }
 0x20e   :  { %v395_v0 = vpack.c.bf16 %v386_v62, %v385_v61 }
 0x210   :  { %888 = vmatprep.mubr.bf16.mxu0 %v395_v0 }
 0x211   :  { %889 = vmatmul.mubr.bf16.gmra.mrb[28].mxu0 %v396_v63 }
 0x2cc   :  { %v878_v1 = vpop.f32.mrb[16].mxu0 }
 0x2cd   :  { %v495_v2 = vpop.f32.mrb[17].mxu0 }
 0x2ce   :  { %v879_v3 = vpop.f32.mrb[18].mxu0 }
 0x2cf   :  { %v559_v4 = vpack.c.bf16 %v879_v3, %v878_v1  ;;  %v498_v5 = vpop.f32.mrb[19].mxu0 }
 0x2d0   :  { %v558_v6 = vpack.c.bf16 %v498_v5, %v495_v2 }
 0x2d2   :  { %892 = vmatprep.subr.bf16.mxu1 %v558_v6 }
 0x2d3   :  { %893 = vmatpush3.bf16.msra.mxu1 %v558_v6 }
 0x2d4   :  { %v882_v7 = vpop.f32.mrb[20].mxu0  ;;  %894 = vmatprep.subr.bf16.mxu1 %v559_v4 }
 0x2d5   :  { %v511_v8 = vpop.f32.mrb[21].mxu0 }
 0x2d6   :  { %v883_v60 = vpop.f32.mrb[22].mxu0 }
 0x2d7   :  { %v561_v9 = vpack.c.bf16 %v883_v60, %v882_v7  ;;  %v514_v10 = vpop.f32.mrb[23].mxu0  ;;  %895 = vmatpush3.bf16.msra.mxu1 %v559_v4 }
 0x2d8   :  { %v560_v11 = vpack.c.bf16 %v514_v10, %v511_v8 }
 0x2da   :  { %896 = vmatprep.subr.bf16.mxu1 %v560_v11 }
 0x2db   :  { %897 = vmatpush3.bf16.msra.mxu1 %v560_v11 }
 0x2dc   :  { %v886_v12 = vpop.f32.mrb[24].mxu0  ;;  %898 = vmatprep.subr.bf16.mxu1 %v561_v9 }
 0x2dd   :  { %v527_v13 = vpop.f32.mrb[25].mxu0 }
 0x2de   :  { %v887_v14 = vpop.f32.mrb[26].mxu0 }
 0x2df   :  { %v563_v15 = vpack.c.bf16 %v887_v14, %v886_v12  ;;  %v530_v17 = vpop.f32.mrb[27].mxu0  ;;  %899 = vmatpush3.bf16.msra.mxu1 %v561_v9 }
 0x2e0   :  { %v562_v18 = vpack.c.bf16 %v530_v17, %v527_v13 }
 0x2e2   :  { %900 = vmatprep.subr.bf16.mxu1 %v562_v18 }
 0x2e3   :  { %901 = vmatpush3.bf16.msra.mxu1 %v562_v18 }
 0x2e4   :  { %v890_v19 = vpop.f32.mrb[28].mxu0  ;;  %902 = vmatprep.subr.bf16.mxu1 %v563_v15 }
 0x2e5   :  { %v543_v20 = vpop.f32.mrb[29].mxu0 }
 0x2e6   :  { %v891_v21 = vpop.f32.mrb[30].mxu0 }
 0x2e7   :  { %v565_v22 = vpack.c.bf16 %v891_v21, %v890_v19  ;;  %v546_v23 = vpop.f32.mrb[31].mxu0  ;;  %903 = vmatpush3.bf16.msra.mxu1 %v563_v15 }
 0x2e8   :  { %v564_v24 = vpack.c.bf16 %v546_v23, %v543_v20 }
 0x2ea   :  { %904 = vmatprep.subr.bf16.mxu1 %v564_v24 }
 0x2eb   :  { %905 = vmatpush3.bf16.msra.mxu1 %v564_v24 }
 0x2ec   :  { %906 = vmatprep.subr.bf16.mxu1 %v565_v22 }
 0x2ef   :  { %907 = vmatpush3.bf16.msra.mxu1 %v565_v22 }
 0x2f2   :  { %909 = vmatmul.mubr.bf16.vlgmr.msra.gmra.mrb[16].mxu1 %v29_v49 }
 0x2f3   :  { %912 = vmatprep.mubr.bf16.mxu1 %v30_v50 }
 0x2fa   :  { %913 = vmatmul.mubr.bf16.gmra.mrb[20].mxu1 %v31_v52 }
 0x2fb   :  { %916 = vmatprep.mubr.bf16.mxu1 %v32_v53 }
 0x302   :  { %917 = vmatmul.mubr.bf16.gmra.mrb[24].mxu1 %v33_v55 }
 0x303   :  { %920 = vmatprep.mubr.bf16.mxu1 %v34_v56 }
 0x30a   :  { %921 = vmatmul.mubr.bf16.gmra.mrb[28].mxu1 %v35_v57 }
 0x3c5   :  { %v910_v49 = vpop.f32.mrb[16].mxu1 }
 0x3c6   :  { %v616_v50 = vadd.f32 %v910_v49, %v731_v16  ;;  %v607_v48 = vpop.f32.mrb[17].mxu1 }
 0x3c7   :  { %v608_v52 = vadd.f32 %v731_v16, %v607_v48  ;;  %v911_v25 = vpop.f32.mrb[18].mxu1 }
 0x3c8   :  { %v672_v26 = vmax.f32 %v616_v50, 0.0  ;;  %v619_v53 = vadd.f32 %v911_v25, %v731_v16  ;;  %v610_v27 = vpop.f32.mrb[19].mxu1 }
 0x3c9   :  { %v670_v51 = vmax.f32 %v608_v52, 0.0  ;;  %v611_v55 = vadd.f32 %v731_v16, %v610_v27 }
 0x3ca   :  { %688 = vst [vmem:[%s1175_s6 + $0x10] sm:$0xff] %v672_v26  ;;  %v673_v54 = vmax.f32 %v619_v53, 0.0 }
 0x3cb   :  { %686 = vst [vmem:[%s1175_s6] sm:$0xff] %v670_v51  ;;  %v671_v56 = vmax.f32 %v611_v55, 0.0 }
 0x3cc   :  { %689 = vst [vmem:[%s1175_s6 + $0x18] sm:$0xff] %v673_v54 }
 0x3cd   :  { %687 = vst [vmem:[%s1175_s6 + $0x8] sm:$0xff] %v671_v56  ;;  %v914_v57 = vpop.f32.mrb[20].mxu1 }
 0x3ce   :  { %v632_v28 = vadd.f32 %v914_v57, %v731_v16  ;;  %v623_v29 = vpop.f32.mrb[21].mxu1 }
 0x3cf   :  { %v624_v30 = vadd.f32 %v731_v16, %v623_v29  ;;  %v915_v31 = vpop.f32.mrb[22].mxu1 }
 0x3d0   :  { %v676_v32 = vmax.f32 %v632_v28, 0.0  ;;  %v635_v33 = vadd.f32 %v915_v31, %v731_v16  ;;  %v626_v34 = vpop.f32.mrb[23].mxu1 }
 0x3d1   :  { %v674_v35 = vmax.f32 %v624_v30, 0.0  ;;  %v627_v36 = vadd.f32 %v731_v16, %v626_v34 }
 0x3d2   :  { %692 = vst [vmem:[%s1175_s6 + $0x30] sm:$0xff] %v676_v32  ;;  %v677_v37 = vmax.f32 %v635_v33, 0.0 }
 0x3d3   :  { %690 = vst [vmem:[%s1175_s6 + $0x20] sm:$0xff] %v674_v35  ;;  %v675_v38 = vmax.f32 %v627_v36, 0.0 }
 0x3d4   :  { %693 = vst [vmem:[%s1175_s6 + $0x38] sm:$0xff] %v677_v37 }
 0x3d5   :  { %691 = vst [vmem:[%s1175_s6 + $0x28] sm:$0xff] %v675_v38  ;;  %v918_v39 = vpop.f32.mrb[24].mxu1 }
 0x3d6   :  { %v648_v40 = vadd.f32 %v918_v39, %v731_v16  ;;  %v639_v41 = vpop.f32.mrb[25].mxu1 }
 0x3d7   :  { %v640_v42 = vadd.f32 %v731_v16, %v639_v41  ;;  %v919_v43 = vpop.f32.mrb[26].mxu1 }
 0x3d8   :  { %v680_v44 = vmax.f32 %v648_v40, 0.0  ;;  %v651_v45 = vadd.f32 %v919_v43, %v731_v16  ;;  %v642_v46 = vpop.f32.mrb[27].mxu1 }
 0x3d9   :  { %v678_v47 = vmax.f32 %v640_v42, 0.0  ;;  %v643_v58 = vadd.f32 %v731_v16, %v642_v46 }
 0x3da   :  { %696 = vst [vmem:[%s1175_s6 + $0x50] sm:$0xff] %v680_v44  ;;  %v681_v59 = vmax.f32 %v651_v45, 0.0 }
 0x3db   :  { %694 = vst [vmem:[%s1175_s6 + $0x40] sm:$0xff] %v678_v47  ;;  %v679_v61 = vmax.f32 %v643_v58, 0.0 }
 0x3dc   :  { %697 = vst [vmem:[%s1175_s6 + $0x58] sm:$0xff] %v681_v59 }
 0x3dd   :  { %695 = vst [vmem:[%s1175_s6 + $0x48] sm:$0xff] %v679_v61  ;;  %v922_v62 = vpop.f32.mrb[28].mxu1 }
 0x3de   :  { %v664_v63 = vadd.f32 %v922_v62, %v731_v16  ;;  %v655_v0 = vpop.f32.mrb[29].mxu1 }
 0x3df   :  { %v656_v1 = vadd.f32 %v731_v16, %v655_v0  ;;  %v923_v2 = vpop.f32.mrb[30].mxu1 }
 0x3e0   :  { %v684_v3 = vmax.f32 %v664_v63, 0.0  ;;  %v667_v4 = vadd.f32 %v923_v2, %v731_v16  ;;  %v658_v5 = vpop.f32.mrb[31].mxu1 }
 0x3e1   :  { %v682_v6 = vmax.f32 %v656_v1, 0.0  ;;  %v659_v7 = vadd.f32 %v731_v16, %v658_v5 }
 0x3e2   :  { %700 = vst [vmem:[%s1175_s6 + $0x70] sm:$0xff] %v684_v3  ;;  %v685_v8 = vmax.f32 %v667_v4, 0.0 }
 0x3e3   :  { %698 = vst [vmem:[%s1175_s6 + $0x60] sm:$0xff] %v682_v6  ;;  %v683_v60 = vmax.f32 %v659_v7, 0.0 }
 0x3e4   :  { %701 = vst [vmem:[%s1175_s6 + $0x78] sm:$0xff] %v685_v8 }
 0x3e5   :  { %699 = vst [vmem:[%s1175_s6 + $0x68] sm:$0xff] %v683_v60 }

</bundles_post_ra>
